<compile_context>
chip_gen: v5e
topology: v5e:2x2
jax: 0.10.0
libtpu: 0.0.40
codegen_flags: <defaults>
</compile_context>

<pallas_src>
import functools
import math

import jax
import jax.numpy as jnp
from jax.experimental import pallas as pl
from jax.experimental.pallas import tpu as pltpu

_LANE = 128            # lane width: feature dims padded to multiples of this
_SUBLANE_BF16 = 16     # bf16 sublane packing: batch tiles padded to multiples of this


def _round_up(x, m):
    return ((x + m - 1) // m) * m


def _vmem_budgets():
    """(vmem_limit_bytes, fused_residency_budget_bytes) — TPU-generation aware."""
    cap = None
    try:
        cap = int(pltpu.get_tpu_info().vmem_capacity_bytes)
    except Exception:
        cap = None
    if not cap or cap <= 0:
        cap = 64 * 1024 * 1024                    # unknown -> assume smallest (v7x-safe)
    if cap >= 96 * 1024 * 1024:                   # v5e / v6e: 128 MiB physical VMEM
        return 100 * 1024 * 1024, 80 * 1024 * 1024
    return 48 * 1024 * 1024, 36 * 1024 * 1024     # v7x: 64 MiB physical VMEM


# ---------------------------------------------------------------------------
# One-time parameter preparation (pad to lane multiples, cast to bf16/f32).
# ---------------------------------------------------------------------------
def prepare_params(params, input_dim):
    """Pad + cast weights once so forward passes do zero HBM re-layout work."""
    dims = [input_dim] + [w.shape[1] for (w, _) in params]
    pdims = [_round_up(d, _LANE) for d in dims]
    padded = []
    for i, (w, b) in enumerate(params):
        n, k = w.shape
        wp = jnp.zeros((pdims[i], pdims[i + 1]), jnp.bfloat16).at[:n, :k].set(
            w.astype(jnp.bfloat16))
        bp = jnp.zeros((1, pdims[i + 1]), jnp.float32).at[0, :k].set(
            b.astype(jnp.float32))
        padded.append((wp, bp))
    return {"dims": dims, "pdims": pdims, "padded": padded}


# ---------------------------------------------------------------------------
# Fused MLP kernel: all layers in one pallas_call, weights resident in VMEM.
# ---------------------------------------------------------------------------
def _fused_mlp_kernel(*refs, num_layers):
    x_ref = refs[0]
    o_ref = refs[-1]
    wb = refs[1:-1]                                   # [w0, b0, w1, b1, ...]
    h = x_ref[...]                                    # bf16 (tm, pdims[0])
    for i in range(num_layers):
        w = wb[2 * i][...]                            # bf16 (d_i, d_{i+1})
        b = wb[2 * i + 1][...]                        # f32  (1,   d_{i+1})
        y = jnp.dot(h, w, preferred_element_type=jnp.float32) + b
        if i < num_layers - 1:
            h = jnp.maximum(y, 0.0).astype(jnp.bfloat16)   # back to bf16 for next MXU pass
        else:
            o_ref[...] = y.astype(o_ref.dtype)


def _resident_spec(shape, single_buffer):
    """Constant-index (VMEM-resident) BlockSpec; single-buffered when supported."""
    if single_buffer and hasattr(pl, "Buffered"):
        try:
            return pl.BlockSpec(shape, lambda i: (0, 0), pipeline_mode=pl.Buffered(1))
        except TypeError:
            pass
    return pl.BlockSpec(shape, lambda i: (0, 0))


def _fused_vmem_bytes(tm, pdims):
    x_b = 2 * tm * pdims[0] * 2                 # double-buffered bf16 input tile
    o_b = 2 * tm * pdims[-1] * 4                # double-buffered output tile (f32 worst case)
    w_b = sum(pdims[i] * pdims[i + 1] * 2 + pdims[i + 1] * 4
              for i in range(len(pdims) - 1))   # SINGLE-buffered resident weights/biases
    act_b = 3 * tm * max(pdims) * 4             # f32 y + bf16 h + compiler-temp slack
    return x_b + o_b + w_b + act_b


def _pick_fused_batch_tile(B, batch_tile):
    """Batch tile (multiple of 16); prefer >=2 tiles so both v7x TCs get work."""
    B16 = _round_up(B, _SUBLANE_BF16)
    tm = min(batch_tile, B16)
    if B16 >= 2 * _SUBLANE_BF16 and _round_up(B, tm) // tm < 2:
        tm = _round_up((B16 + 1) // 2, _SUBLANE_BF16)
    return tm


def _mlp_fused(x, prep, tm, out_dtype, vmem_limit, single_buffer):
    B = x.shape[0]
    dims, pdims, padded = prep["dims"], prep["pdims"], prep["padded"]
    num_layers = len(padded)
    Bp = _round_up(B, tm)

    xp = jnp.zeros((Bp, pdims[0]), jnp.bfloat16).at[:B, :dims[0]].set(
        x.astype(jnp.bfloat16))

    flat_args = [xp]
    in_specs = [pl.BlockSpec((tm, pdims[0]), lambda i: (i, 0))]
    for li, (wp, bp) in enumerate(padded):
        flat_args += [wp, bp]
        # Constant index_map => block never changes => fetched once, stays resident.
        in_specs += [_resident_spec((pdims[li], pdims[li + 1]), single_buffer),
                     _resident_spec((1, pdims[li + 1]), single_buffer)]

    flops = sum(2 * B * dims[i] * dims[i + 1] for i in range(num_layers))
    bytes_accessed = (xp.size * 2
                      + sum(a.size * a.dtype.itemsize for a in flat_args[1:])
                      + Bp * pdims[-1] * jnp.dtype(out_dtype).itemsize)

    out = pl.pallas_call(
        functools.partial(_fused_mlp_kernel, num_layers=num_layers),
        out_shape=jax.ShapeDtypeStruct((Bp, pdims[-1]), out_dtype),
        grid=(Bp // tm,),
        in_specs=in_specs,
        out_specs=pl.BlockSpec((tm, pdims[-1]), lambda i: (i, 0)),
        compiler_params=pltpu.CompilerParams(
            dimension_semantics=("parallel",),
            vmem_limit_bytes=vmem_limit,
        ),
        cost_estimate=pl.CostEstimate(
            flops=flops, transcendentals=0, bytes_accessed=bytes_accessed),
    )(*flat_args)
    return out[:B, :dims[-1]]


# ---------------------------------------------------------------------------
# Fallback: per-layer tiled matmul, f32 accumulator, K reduction last.
# ---------------------------------------------------------------------------
def _tiled_linear_kernel(x_ref, w_ref, b_ref, o_ref, acc_ref, *, apply_relu):
    k = pl.program_id(2)

    @pl.when(k == 0)
    def _():
        acc_ref[...] = jnp.zeros_like(acc_ref)

    acc_ref[...] += jnp.dot(x_ref[...], w_ref[...],
                            preferred_element_type=jnp.float32)

    @pl.when(k == pl.num_programs(2) - 1)
    def _():
        y = acc_ref[...] + b_ref[...]          # bias/ReLU only in the epilogue
        if apply_relu:
            y = jnp.maximum(y, 0.0)
        o_ref[...] = y.astype(o_ref.dtype)


def _pick_tile(dim_padded, target):
    """Largest multiple of 128 <= target that divides dim_padded (itself a 128-multiple)."""
    t = min(target, dim_padded)
    t -= t % _LANE
    t = max(t, _LANE)
    while dim_padded % t:
        t -= _LANE
    return t


def _linear_tiled(xp, wp, bp, *, apply_relu, out_dtype, tm, tn, tk,
                  vmem_limit, flops):
    Bp, Kp = xp.shape
    Np = wp.shape[1]
    return pl.pallas_call(
        functools.partial(_tiled_linear_kernel, apply_relu=apply_relu),
        out_shape=jax.ShapeDtypeStruct((Bp, Np), out_dtype),
        grid=(Bp // tm, Np // tn, Kp // tk),
        in_specs=[
            pl.BlockSpec((tm, tk), lambda i, j, k: (i, k)),
            pl.BlockSpec((tk, tn), lambda i, j, k: (k, j)),
            pl.BlockSpec((1, tn), lambda i, j, k: (0, j)),
        ],
        out_specs=pl.BlockSpec((tm, tn), lambda i, j, k: (i, j)),
        scratch_shapes=[pltpu.VMEM((tm, tn), jnp.float32)],
        compiler_params=pltpu.CompilerParams(
            dimension_semantics=("parallel", "parallel", "arbitrary"),
            vmem_limit_bytes=vmem_limit,
        ),
        cost_estimate=pl.CostEstimate(
            flops=flops, transcendentals=0,
            bytes_accessed=(xp.size * 2 + wp.size * 2 + bp.size * 4
                            + Bp * Np * jnp.dtype(out_dtype).itemsize)),
    )(xp, wp, bp)


def _mlp_tiled(x, prep, out_dtype, vmem_limit, *, tm=512, tn=512, tk=1024):
    B = x.shape[0]
    dims, pdims, padded = prep["dims"], prep["pdims"], prep["padded"]
    num_layers = len(padded)
    tm = min(tm, _round_up(B, _SUBLANE_BF16))
    Bp = _round_up(B, tm)

    # Pad the activation ONCE; stay padded + bf16 between layers (no re-pad / slice
    # round-trips, and intermediate HBM writeback is halved vs f32).
    h = jnp.zeros((Bp, pdims[0]), jnp.bfloat16).at[:B, :dims[0]].set(
        x.astype(jnp.bfloat16))
    for i, (wp, bp) in enumerate(padded):
        last = (i == num_layers - 1)
        h = _linear_tiled(
            h, wp, bp,
            apply_relu=not last,
            out_dtype=(out_dtype if last else jnp.bfloat16),
            tm=tm,
            tn=_pick_tile(pdims[i + 1], tn),
            tk=_pick_tile(pdims[i], tk),
            vmem_limit=vmem_limit,
            flops=2 * B * dims[i] * dims[i + 1])
    return h[:B, :dims[-1]]


# ---------------------------------------------------------------------------
# Public forward + params init + reference
# ---------------------------------------------------------------------------
def mlp_forward(x, params, *, batch_tile=256, out_dtype=jnp.float32,
                force_tiled=False):
    """params: raw [(w, b), ...] or the dict returned by prepare_params()."""
    prep = params if isinstance(params, dict) else prepare_params(params, x.shape[1])
    vmem_limit, fused_budget = _vmem_budgets()
    pdims = prep["pdims"]
    tm = _pick_fused_batch_tile(x.shape[0], batch_tile)

    if not force_tiled and _fused_vmem_bytes(tm, pdims) <= fused_budget:
        try:
            return _mlp_fused(x, prep, tm, out_dtype, vmem_limit, single_buffer=True)
        except Exception:
            # pl.Buffered(1) not supported by this jax version/backend:
            # retry with plain (double-buffered) resident specs.
            return _mlp_fused(x, prep, tm, out_dtype, vmem_limit, single_buffer=False)

    # Weights too large for VMEM residency: tiled pallas_call per layer.
    return _mlp_tiled(x, prep, out_dtype, vmem_limit)


def init_mlp_params(key, input_dim, hidden_dim, output_dim, num_hidden_layers):
    """Mirrors nn.Linear default init: U(-1/sqrt(fan_in), 1/sqrt(fan_in)) for W and b."""
    h = [hidden_dim] * num_hidden_layers
    dims_in = [input_dim] + h
    dims_out = h + [output_dim]
    params = []
    for n, k in zip(dims_in, dims_out):
        key, kw, kb = jax.random.split(key, 3)
        bound = 1.0 / math.sqrt(n)
        # stored as (in_features, out_features); PyTorch stores (out, in).
        w = jax.random.uniform(kw, (n, k), jnp.float32, minval=-bound, maxval=bound)
        bias = jax.random.uniform(kb, (k,), jnp.float32, minval=-bound, maxval=bound)
        params.append((w, bias))
    return params


def mlp_reference(x, params):
    # Pure-JAX f32 reference for correctness check.
    num_layers = len(params)
    for i, (w, b) in enumerate(params):
        x = x @ w + b
        if i < num_layers - 1:
            x = jnp.maximum(x, 0.0)
    return x


if __name__ == "__main__":
    key = jax.random.PRNGKey(0)
    batch = 8
    input_dim, hidden_dim, output_dim, num_hidden_layers = 16, 32, 8, 2

    kx, kp = jax.random.split(key)
    x = jax.random.normal(kx, (batch, input_dim), jnp.float32)
    params = init_mlp_params(kp, input_dim, hidden_dim, output_dim, num_hidden_layers)
    prep = prepare_params(params, input_dim)     # pad / cast weights exactly once

    ref = mlp_reference(x, params)

    # Fused (weights VMEM-resident, single-buffered) path.
    out_fused = jax.block_until_ready(mlp_forward(x, prep))
    assert out_fused.shape == (batch, output_dim)
    assert jnp.allclose(out_fused, ref, atol=5e-2, rtol=5e-2), \
        f"fused max abs err {float(jnp.max(jnp.abs(out_fused - ref)))}"

    # Tiled per-layer fallback path (exercised explicitly for coverage).
    out_tiled = jax.block_until_ready(mlp_forward(x, prep, force_tiled=True))
    assert out_tiled.shape == (batch, output_dim)
    assert jnp.allclose(out_tiled, ref, atol=5e-2, rtol=5e-2), \
        f"tiled max abs err {float(jnp.max(jnp.abs(out_tiled - ref)))}"

    print("KERNEL_OK")
</pallas_src>

<mosaic_0001>
module attributes {stable_mosaic.version = 11 : i64} {
  func.func @_fused_mlp_kernel(%arg0: i32, %arg1: memref<16x128xbf16, #tpu.memory_space<vmem>>, %arg2: memref<128x128xbf16, #tpu.memory_space<vmem>>, %arg3: memref<1x128xf32, #tpu.memory_space<vmem>>, %arg4: memref<128x128xbf16, #tpu.memory_space<vmem>>, %arg5: memref<1x128xf32, #tpu.memory_space<vmem>>, %arg6: memref<128x128xbf16, #tpu.memory_space<vmem>>, %arg7: memref<1x128xf32, #tpu.memory_space<vmem>>, %arg8: memref<16x128xf32, #tpu.memory_space<vmem>>) attributes {dimension_semantics = [#tpu.dimension_semantics<parallel>], iteration_bounds = array<i64: 1>, scalar_prefetch = 0 : i64, scratch_operands = 0 : i64, tpu.core_type = #tpu.core_type<tc>, window_params = [{transform_indices = @transform_0, window_bounds = array<i64: 16, 128>}, {pipeline_mode = #tpu.pipeline_mode<synchronous>, transform_indices = @transform_1, window_bounds = array<i64: 128, 128>}, {pipeline_mode = #tpu.pipeline_mode<synchronous>, transform_indices = @transform_2, window_bounds = array<i64: 1, 128>}, {pipeline_mode = #tpu.pipeline_mode<synchronous>, transform_indices = @transform_3, window_bounds = array<i64: 128, 128>}, {pipeline_mode = #tpu.pipeline_mode<synchronous>, transform_indices = @transform_4, window_bounds = array<i64: 1, 128>}, {pipeline_mode = #tpu.pipeline_mode<synchronous>, transform_indices = @transform_5, window_bounds = array<i64: 128, 128>}, {pipeline_mode = #tpu.pipeline_mode<synchronous>, transform_indices = @transform_6, window_bounds = array<i64: 1, 128>}, {transform_indices = @transform_7, window_bounds = array<i64: 16, 128>}]} {
    %c0 = arith.constant 0 : index
    %c0_0 = arith.constant 0 : index
    %0 = vector.load %arg1[%c0, %c0_0] : memref<16x128xbf16, #tpu.memory_space<vmem>>, vector<16x128xbf16>
    %c0_1 = arith.constant 0 : index
    %c0_2 = arith.constant 0 : index
    %1 = vector.load %arg2[%c0_1, %c0_2] : memref<128x128xbf16, #tpu.memory_space<vmem>>, vector<128x128xbf16>
    %c0_3 = arith.constant 0 : index
    %c0_4 = arith.constant 0 : index
    %2 = vector.load %arg3[%c0_3, %c0_4] : memref<1x128xf32, #tpu.memory_space<vmem>>, vector<1x128xf32>
    %cst = arith.constant dense<0.000000e+00> : vector<16x128xf32>
    %3 = tpu.matmul %0, %1, %cst {dimension_numbers = #tpu.dot_dimension_numbers<[1], [0], [0], [1], [0, 0, 1, 1], [], []>} : vector<16x128xbf16>, vector<128x128xbf16>, vector<16x128xf32> -> vector<16x128xf32>
    %4 = vector.broadcast %2 : vector<1x128xf32> to vector<16x128xf32>
    %5 = arith.addf %3, %4 : vector<16x128xf32>
    %cst_5 = arith.constant 0.000000e+00 : f32
    %6 = vector.broadcast %cst_5 : f32 to vector<16x128xf32>
    %7 = arith.maximumf %5, %6 : vector<16x128xf32>
    %8 = arith.truncf %7 : vector<16x128xf32> to vector<16x128xbf16>
    %c0_6 = arith.constant 0 : index
    %c0_7 = arith.constant 0 : index
    %9 = vector.load %arg4[%c0_6, %c0_7] : memref<128x128xbf16, #tpu.memory_space<vmem>>, vector<128x128xbf16>
    %c0_8 = arith.constant 0 : index
    %c0_9 = arith.constant 0 : index
    %10 = vector.load %arg5[%c0_8, %c0_9] : memref<1x128xf32, #tpu.memory_space<vmem>>, vector<1x128xf32>
    %cst_10 = arith.constant dense<0.000000e+00> : vector<16x128xf32>
    %11 = tpu.matmul %8, %9, %cst_10 {dimension_numbers = #tpu.dot_dimension_numbers<[1], [0], [0], [1], [0, 0, 1, 1], [], []>} : vector<16x128xbf16>, vector<128x128xbf16>, vector<16x128xf32> -> vector<16x128xf32>
    %12 = vector.broadcast %10 : vector<1x128xf32> to vector<16x128xf32>
    %13 = arith.addf %11, %12 : vector<16x128xf32>
    %cst_11 = arith.constant 0.000000e+00 : f32
    %14 = vector.broadcast %cst_11 : f32 to vector<16x128xf32>
    %15 = arith.maximumf %13, %14 : vector<16x128xf32>
    %16 = arith.truncf %15 : vector<16x128xf32> to vector<16x128xbf16>
    %c0_12 = arith.constant 0 : index
    %c0_13 = arith.constant 0 : index
    %17 = vector.load %arg6[%c0_12, %c0_13] : memref<128x128xbf16, #tpu.memory_space<vmem>>, vector<128x128xbf16>
    %c0_14 = arith.constant 0 : index
    %c0_15 = arith.constant 0 : index
    %18 = vector.load %arg7[%c0_14, %c0_15] : memref<1x128xf32, #tpu.memory_space<vmem>>, vector<1x128xf32>
    %cst_16 = arith.constant dense<0.000000e+00> : vector<16x128xf32>
    %19 = tpu.matmul %16, %17, %cst_16 {dimension_numbers = #tpu.dot_dimension_numbers<[1], [0], [0], [1], [0, 0, 1, 1], [], []>} : vector<16x128xbf16>, vector<128x128xbf16>, vector<16x128xf32> -> vector<16x128xf32>
    %20 = vector.broadcast %18 : vector<1x128xf32> to vector<16x128xf32>
    %21 = arith.addf %19, %20 : vector<16x128xf32>
    %c0_17 = arith.constant 0 : index
    %c0_18 = arith.constant 0 : index
    %22 = vector.load %arg8[%c0_17, %c0_18] : memref<16x128xf32, #tpu.memory_space<vmem>>, vector<16x128xf32>
    tpu.vector_store %arg8[%c0_17, %c0_18], %21 {strides = array<i32>} : memref<16x128xf32, #tpu.memory_space<vmem>>, vector<16x128xf32>,
    return
  }
  func.func @transform_0(%arg0: i32) -> (i32, i32) {
    %c0_i32 = arith.constant 0 : i32
    %c0_i32_0 = arith.constant 0 : i32
    return %arg0, %c0_i32 : i32, i32
  }
  func.func @transform_1(%arg0: i32) -> (i32, i32) {
    %c0_i32 = arith.constant 0 : i32
    %c0_i32_0 = arith.constant 0 : i32
    %c0_i32_1 = arith.constant 0 : i32
    return %c0_i32, %c0_i32_0 : i32, i32
  }
  func.func @transform_2(%arg0: i32) -> (i32, i32) {
    %c0_i32 = arith.constant 0 : i32
    %c0_i32_0 = arith.constant 0 : i32
    %c0_i32_1 = arith.constant 0 : i32
    return %c0_i32, %c0_i32_0 : i32, i32
  }
  func.func @transform_3(%arg0: i32) -> (i32, i32) {
    %c0_i32 = arith.constant 0 : i32
    %c0_i32_0 = arith.constant 0 : i32
    %c0_i32_1 = arith.constant 0 : i32
    return %c0_i32, %c0_i32_0 : i32, i32
  }
  func.func @transform_4(%arg0: i32) -> (i32, i32) {
    %c0_i32 = arith.constant 0 : i32
    %c0_i32_0 = arith.constant 0 : i32
    %c0_i32_1 = arith.constant 0 : i32
    return %c0_i32, %c0_i32_0 : i32, i32
  }
  func.func @transform_5(%arg0: i32) -> (i32, i32) {
    %c0_i32 = arith.constant 0 : i32
    %c0_i32_0 = arith.constant 0 : i32
    %c0_i32_1 = arith.constant 0 : i32
    return %c0_i32, %c0_i32_0 : i32, i32
  }
  func.func @transform_6(%arg0: i32) -> (i32, i32) {
    %c0_i32 = arith.constant 0 : i32
    %c0_i32_0 = arith.constant 0 : i32
    %c0_i32_1 = arith.constant 0 : i32
    return %c0_i32, %c0_i32_0 : i32, i32
  }
  func.func @transform_7(%arg0: i32) -> (i32, i32) {
    %c0_i32 = arith.constant 0 : i32
    %c0_i32_0 = arith.constant 0 : i32
    return %arg0, %c0_i32 : i32, i32
  }
}

module attributes {stable_mosaic.version = 11 : i64} {
  func.func @_fused_mlp_kernel(%arg0: i32, %arg1: memref<16x128xbf16, #tpu.memory_space<vmem>>, %arg2: memref<128x128xbf16, #tpu.memory_space<vmem>>, %arg3: memref<1x128xf32, #tpu.memory_space<vmem>>, %arg4: memref<128x128xbf16, #tpu.memory_space<vmem>>, %arg5: memref<1x128xf32, #tpu.memory_space<vmem>>, %arg6: memref<128x128xbf16, #tpu.memory_space<vmem>>, %arg7: memref<1x128xf32, #tpu.memory_space<vmem>>, %arg8: memref<16x128xf32, #tpu.memory_space<vmem>>) attributes {dimension_semantics = [#tpu.dimension_semantics<parallel>], iteration_bounds = array<i64: 1>, scalar_prefetch = 0 : i64, scratch_operands = 0 : i64, tpu.core_type = #tpu.core_type<tc>, window_params = [{transform_indices = @transform_0, window_bounds = array<i64: 16, 128>}, {pipeline_mode = #tpu.pipeline_mode<synchronous>, transform_indices = @transform_1, window_bounds = array<i64: 128, 128>}, {pipeline_mode = #tpu.pipeline_mode<synchronous>, transform_indices = @transform_2, window_bounds = array<i64: 1, 128>}, {pipeline_mode = #tpu.pipeline_mode<synchronous>, transform_indices = @transform_3, window_bounds = array<i64: 128, 128>}, {pipeline_mode = #tpu.pipeline_mode<synchronous>, transform_indices = @transform_4, window_bounds = array<i64: 1, 128>}, {pipeline_mode = #tpu.pipeline_mode<synchronous>, transform_indices = @transform_5, window_bounds = array<i64: 128, 128>}, {pipeline_mode = #tpu.pipeline_mode<synchronous>, transform_indices = @transform_6, window_bounds = array<i64: 1, 128>}, {transform_indices = @transform_7, window_bounds = array<i64: 16, 128>}]} {
    %c0 = arith.constant 0 : index
    %c0_0 = arith.constant 0 : index
    %0 = vector.load %arg1[%c0, %c0_0] : memref<16x128xbf16, #tpu.memory_space<vmem>>, vector<16x128xbf16>
    %c0_1 = arith.constant 0 : index
    %c0_2 = arith.constant 0 : index
    %1 = vector.load %arg2[%c0_1, %c0_2] : memref<128x128xbf16, #tpu.memory_space<vmem>>, vector<128x128xbf16>
    %c0_3 = arith.constant 0 : index
    %c0_4 = arith.constant 0 : index
    %2 = vector.load %arg3[%c0_3, %c0_4] : memref<1x128xf32, #tpu.memory_space<vmem>>, vector<1x128xf32>
    %cst = arith.constant dense<0.000000e+00> : vector<16x128xf32>
    %3 = tpu.matmul %0, %1, %cst {dimension_numbers = #tpu.dot_dimension_numbers<[1], [0], [0], [1], [0, 0, 1, 1], [], []>} : vector<16x128xbf16>, vector<128x128xbf16>, vector<16x128xf32> -> vector<16x128xf32>
    %4 = vector.broadcast %2 : vector<1x128xf32> to vector<16x128xf32>
    %5 = arith.addf %3, %4 : vector<16x128xf32>
    %cst_5 = arith.constant 0.000000e+00 : f32
    %6 = vector.broadcast %cst_5 : f32 to vector<16x128xf32>
    %7 = arith.maximumf %5, %6 : vector<16x128xf32>
    %8 = arith.truncf %7 : vector<16x128xf32> to vector<16x128xbf16>
    %c0_6 = arith.constant 0 : index
    %c0_7 = arith.constant 0 : index
    %9 = vector.load %arg4[%c0_6, %c0_7] : memref<128x128xbf16, #tpu.memory_space<vmem>>, vector<128x128xbf16>
    %c0_8 = arith.constant 0 : index
    %c0_9 = arith.constant 0 : index
    %10 = vector.load %arg5[%c0_8, %c0_9] : memref<1x128xf32, #tpu.memory_space<vmem>>, vector<1x128xf32>
    %cst_10 = arith.constant dense<0.000000e+00> : vector<16x128xf32>
    %11 = tpu.matmul %8, %9, %cst_10 {dimension_numbers = #tpu.dot_dimension_numbers<[1], [0], [0], [1], [0, 0, 1, 1], [], []>} : vector<16x128xbf16>, vector<128x128xbf16>, vector<16x128xf32> -> vector<16x128xf32>
    %12 = vector.broadcast %10 : vector<1x128xf32> to vector<16x128xf32>
    %13 = arith.addf %11, %12 : vector<16x128xf32>
    %cst_11 = arith.constant 0.000000e+00 : f32
    %14 = vector.broadcast %cst_11 : f32 to vector<16x128xf32>
    %15 = arith.maximumf %13, %14 : vector<16x128xf32>
    %16 = arith.truncf %15 : vector<16x128xf32> to vector<16x128xbf16>
    %c0_12 = arith.constant 0 : index
    %c0_13 = arith.constant 0 : index
    %17 = vector.load %arg6[%c0_12, %c0_13] : memref<128x128xbf16, #tpu.memory_space<vmem>>, vector<128x128xbf16>
    %c0_14 = arith.constant 0 : index
    %c0_15 = arith.constant 0 : index
    %18 = vector.load %arg7[%c0_14, %c0_15] : memref<1x128xf32, #tpu.memory_space<vmem>>, vector<1x128xf32>
    %cst_16 = arith.constant dense<0.000000e+00> : vector<16x128xf32>
    %19 = tpu.matmul %16, %17, %cst_16 {dimension_numbers = #tpu.dot_dimension_numbers<[1], [0], [0], [1], [0, 0, 1, 1], [], []>} : vector<16x128xbf16>, vector<128x128xbf16>, vector<16x128xf32> -> vector<16x128xf32>
    %20 = vector.broadcast %18 : vector<1x128xf32> to vector<16x128xf32>
    %21 = arith.addf %19, %20 : vector<16x128xf32>
    %c0_17 = arith.constant 0 : index
    %c0_18 = arith.constant 0 : index
    %22 = vector.load %arg8[%c0_17, %c0_18] : memref<16x128xf32, #tpu.memory_space<vmem>>, vector<16x128xf32>
    tpu.vector_store %arg8[%c0_17, %c0_18], %21 {strides = array<i32>} : memref<16x128xf32, #tpu.memory_space<vmem>>, vector<16x128xf32>,
    return
  }
  func.func @transform_0(%arg0: i32) -> (i32, i32) {
    %c0_i32 = arith.constant 0 : i32
    %c0_i32_0 = arith.constant 0 : i32
    return %arg0, %c0_i32 : i32, i32
  }
  func.func @transform_1(%arg0: i32) -> (i32, i32) {
    %c0_i32 = arith.constant 0 : i32
    %c0_i32_0 = arith.constant 0 : i32
    %c0_i32_1 = arith.constant 0 : i32
    return %c0_i32, %c0_i32_0 : i32, i32
  }
  func.func @transform_2(%arg0: i32) -> (i32, i32) {
    %c0_i32 = arith.constant 0 : i32
    %c0_i32_0 = arith.constant 0 : i32
    %c0_i32_1 = arith.constant 0 : i32
    return %c0_i32, %c0_i32_0 : i32, i32
  }
  func.func @transform_3(%arg0: i32) -> (i32, i32) {
    %c0_i32 = arith.constant 0 : i32
    %c0_i32_0 = arith.constant 0 : i32
    %c0_i32_1 = arith.constant 0 : i32
    return %c0_i32, %c0_i32_0 : i32, i32
  }
  func.func @transform_4(%arg0: i32) -> (i32, i32) {
    %c0_i32 = arith.constant 0 : i32
    %c0_i32_0 = arith.constant 0 : i32
    %c0_i32_1 = arith.constant 0 : i32
    return %c0_i32, %c0_i32_0 : i32, i32
  }
  func.func @transform_5(%arg0: i32) -> (i32, i32) {
    %c0_i32 = arith.constant 0 : i32
    %c0_i32_0 = arith.constant 0 : i32
    %c0_i32_1 = arith.constant 0 : i32
    return %c0_i32, %c0_i32_0 : i32, i32
  }
  func.func @transform_6(%arg0: i32) -> (i32, i32) {
    %c0_i32 = arith.constant 0 : i32
    %c0_i32_0 = arith.constant 0 : i32
    %c0_i32_1 = arith.constant 0 : i32
    return %c0_i32, %c0_i32_0 : i32, i32
  }
  func.func @transform_7(%arg0: i32) -> (i32, i32) {
    %c0_i32 = arith.constant 0 : i32
    %c0_i32_0 = arith.constant 0 : i32
    return %arg0, %c0_i32 : i32, i32
  }
}

</mosaic_0001>

<bundles_post_ra>
// kernel: tpu_custom_call.1
= control target key start
LH: loop header
LB: loop body
LE: loop exit
PB: predicated region body
PF: predicated region fallthrough
CT: control target
= control target key end

     0   :  { %12 = vsyncpa [#allocation3], 0  ;;  %s711_s0 = inlined_call_operand.hbm [shape: bf16[16,128], index: 0, kind: input, shape index: {}]   ;;  %s712_s1 = inlined_call_operand.hbm [shape: bf16[128,128], index: 1, kind: input, shape index: {}]   ;;  %s713_s2 = inlined_call_operand.vmem [shape: f32[1,128], index: 2, kind: input, shape index: {}]   ;;  %s714_s3 = inlined_call_operand.hbm [shape: bf16[128,128], index: 3, kind: input, shape index: {}]   ;;  %s715_s4 = inlined_call_operand.vmem [shape: f32[1,128], index: 4, kind: input, shape index: {}]   ;;  %s716_s5 = inlined_call_operand.hbm [shape: bf16[128,128], index: 5, kind: input, shape index: {}]   ;;  %s717_s6 = inlined_call_operand.vmem [shape: f32[1,128], index: 6, kind: input, shape index: {}]   ;;  %s718_s7 = inlined_call_operand.hbm [shape: f32[16,128], index: 7, kind: output, shape index: {}]  }
   0x1   :  { %13 = vsyncpa [#allocation6], 0 }
   0x2   :  { %14 = vsyncpa [#allocation9], 0 }
   0x3   :  { %15 = vsyncpa [#allocation4], 0  ;;  %s33_s26 = sshll.u32 %s712_s1, 4  ;;  %s638_s27 = smov [#allocation5]   ;;  %s34_s26 = int_to_ptr.hbm [resolvable:$true] %s33_s26 }
   0x4   :  { %s35_s28 = sshll.u32 %s638_s27, 4  ;;  %s20_s8 = sshll.u32 %s711_s0, 4  ;;  %s36_s28 = int_to_ptr.vmem [resolvable:$true] %s35_s28  ;;  %s21_s8 = int_to_ptr.hbm [resolvable:$true] %s20_s8 }
   0x5   :  { %s639_s9 = smov 64   ;;  %s640_s10 = smov 4  }
   0x6   :  { %41 = dma.hbm_to_vmem [thread:$0]  %s34_s26, 1024, %s36_s28, [#allocation6], %s639_s9, %s639_s9, %s640_s10  }
   0x7   :  { %s641_s11 = smov [#allocation2]   ;;  %s48_s15 = sshll.u32 %s714_s3, 4  ;;  %s49_s15 = int_to_ptr.hbm [resolvable:$true] %s48_s15 }
   0x8   :  { %s22_s12 = sshll.u32 %s641_s11, 4  ;;  %s63_s17 = sshll.u32 %s716_s5, 4  ;;  %s23_s12 = int_to_ptr.vmem [resolvable:$true] %s22_s12  ;;  %s64_s17 = int_to_ptr.hbm [resolvable:$true] %s63_s17 }
   0x9   :  { %28 = dma.hbm_to_vmem [thread:$0]  %s21_s8, 128, %s23_s12, [#allocation3], %s639_s9, %s639_s9, %s640_s10  }
   0xa   :  { %s642_s18 = smov [#allocation7]   ;;  %s643_s0 = smov [#allocation8]  }
   0xb   :  { %s50_s19 = sshll.u32 %s642_s18, 4  ;;  %s65_s20 = sshll.u32 %s643_s0, 4  ;;  %s51_s19 = int_to_ptr.vmem [resolvable:$true] %s50_s19  ;;  %s66_s20 = int_to_ptr.vmem [resolvable:$true] %s65_s20 }
   0xc   :  { %56 = dma.hbm_to_vmem [thread:$0]  %s49_s15, 1024, %s51_s19, [#allocation6], %s639_s9, %s639_s9, %s640_s10  }
   0xd   :  { %71 = dma.hbm_to_vmem [thread:$0]  %s64_s17, 1024, %s66_s20, [#allocation9], %s639_s9, %s639_s9, %s640_s10  }
   0xe   :  { %630 = dma.done.wait [#allocation3], 128  }
   0xf   :  { %631 = vsyncadd [#allocation3], 4294967168 }
  0x10   :  { %632 = dma.done.wait [#allocation6], 2048  }
  0x11   :  { %633 = vsyncadd [#allocation6], 4294965248 }
  0x12   :  { %634 = dma.done.wait [#allocation9], 1024  }
  0x13   :  { %635 = vsyncadd [#allocation9], 4294966272  ;;  %v481_v0 = vld [vmem:[#allocation5 + $0x38] sm:$0xff]  ;;  %v480_v1 = vld [vmem:[#allocation5 + $0x30] sm:$0xff]  ;;  %s644_s24 = smov [#allocation10]   ;;  %s645_s28 = smov 128  }
  0x14   :  { %166 = vmatpush.bf16.msra.mxu0 %v481_v0  ;;  %v489_v2 = vld [vmem:[#allocation7 + $0x38] sm:$0xff]  ;;  %v488_v3 = vld [vmem:[#allocation7 + $0x30] sm:$0xff]  ;;  %v479_v4 = vld [vmem:[#allocation5 + $0x28] sm:$0xff]  ;;  %s356_s25 = sshll.u32 %s644_s24, 4  ;;  %s646_s29 = smov 8   ;;  %s357_s25 = int_to_ptr.vmem [resolvable:$true] %s356_s25 }
  0x15   :  { %251 = vmatpush.bf16.msra.mxu1 %v489_v2  ;;  %v487_v5 = vld [vmem:[#allocation7 + $0x28] sm:$0xff]  ;;  %v478_v6 = vld [vmem:[#allocation5 + $0x20] sm:$0xff]  ;;  %v477_v8 = vld [vmem:[#allocation5 + $0x18] sm:$0xff] }
  0x16   :  { %v486_v7 = vld [vmem:[#allocation7 + $0x20] sm:$0xff]  ;;  %v476_v9 = vld [vmem:[#allocation5 + $0x10] sm:$0xff]  ;;  %v475_v10 = vld [vmem:[#allocation5 + $0x8] sm:$0xff] }
  0x17   :  { %v474_v11 = vld [vmem:[#allocation5] sm:$0xff]  ;;  %v473_v12 = vld [vmem:[#allocation2] sm:$0xff]  ;;  %v484_v14 = vld [vmem:[#allocation7 + $0x10] sm:$0xff] }
  0x18   :  { %167 = vmatpush.bf16.msra.mxu0 %v480_v1  ;;  %v485_v13 = vld [vmem:[#allocation7 + $0x18] sm:$0xff]  ;;  %v483_v15 = vld [vmem:[#allocation7 + $0x8] sm:$0xff]  ;;  %v482_v16 = vld [vmem:[#allocation7] sm:$0xff] }
  0x19   :  { %252 = vmatpush.bf16.msra.mxu1 %v488_v3  ;;  %v497_v17 = vld [vmem:[#allocation8 + $0x38] sm:$0xff]  ;;  %v496_v18 = vld [vmem:[#allocation8 + $0x30] sm:$0xff]  ;;  %v495_v19 = vld [vmem:[#allocation8 + $0x28] sm:$0xff] }
  0x1a   :  { %336 = vmatpush.bf16.msra.mxu2 %v497_v17  ;;  %v494_v20 = vld [vmem:[#allocation8 + $0x20] sm:$0xff]  ;;  %v507_v22 = vld [vmem:[%s713_s2] ss:$0 sm:$0xff]  ;;  %v492_v30 = vld [vmem:[#allocation8 + $0x10] sm:$0xff] }
  0x1b   :  { %v493_v29 = vld [vmem:[#allocation8 + $0x18] sm:$0xff]  ;;  %v491_v31 = vld [vmem:[#allocation8 + $0x8] sm:$0xff]  ;;  %v490_v32 = vld [vmem:[#allocation8] sm:$0xff] }
  0x1c   :  { %168 = vmatpush.bf16.msra.mxu0 %v479_v4  ;;  %v508_v34 = vld [vmem:[%s715_s4] ss:$0 sm:$0xff]  ;;  %s358_s4 = sshll.u32 %s718_s7, 4  ;;  %s359_s4 = int_to_ptr.hbm [resolvable:$true] %s358_s4 }
  0x1d   :  { %253 = vmatpush.bf16.msra.mxu1 %v487_v5  ;;  %v509_v41 = vld [vmem:[%s717_s6] ss:$0 sm:$0xff] }
  0x1e   :  { %337 = vmatpush.bf16.msra.mxu2 %v496_v18 }
  0x20   :  { %169 = vmatpush.bf16.msra.mxu0 %v478_v6 }
  0x21   :  { %254 = vmatpush.bf16.msra.mxu1 %v486_v7 }
  0x22   :  { %338 = vmatpush.bf16.msra.mxu2 %v495_v19 }
  0x24   :  { %170 = vmatpush.bf16.msra.mxu0 %v477_v8 }
  0x25   :  { %255 = vmatpush.bf16.msra.mxu1 %v485_v13 }
  0x26   :  { %339 = vmatpush.bf16.msra.mxu2 %v494_v20 }
  0x28   :  { %171 = vmatpush.bf16.msra.mxu0 %v476_v9 }
  0x29   :  { %256 = vmatpush.bf16.msra.mxu1 %v484_v14 }
  0x2a   :  { %340 = vmatpush.bf16.msra.mxu2 %v493_v29 }
  0x2c   :  { %172 = vmatpush.bf16.msra.mxu0 %v475_v10 }
  0x2d   :  { %257 = vmatpush.bf16.msra.mxu1 %v483_v15 }
  0x2e   :  { %341 = vmatpush.bf16.msra.mxu2 %v492_v30 }
  0x30   :  { %173 = vmatpush.bf16.msra.mxu0 %v474_v11 }
  0x31   :  { %258 = vmatpush.bf16.msra.mxu1 %v482_v16 }
  0x32   :  { %342 = vmatpush.bf16.msra.mxu2 %v491_v31 }
  0x33   :  { %174 = vmatmul.bf16.vlgmr.msra.gmra.mxu0 %v473_v12 }
  0x36   :  { %343 = vmatpush.bf16.msra.mxu2 %v490_v32 }
  0xb0   :  { %v175_v21 = vpop.f32.mrf.mxu0 }
  0xb1   :  { %v176_v23 = vadd.f32 %v507_v22, %v175_v21 }
  0xb3   :  { %v180_v26 = vmax.f32 %v176_v23, 0.0 }
  0xb8   :  { %v177_v24 = vpop.f32.mrf.mxu0 }
  0xb9   :  { %v178_v25 = vadd.f32 %v507_v22, %v177_v24 }
  0xbb   :  { %v181_v27 = vmax.f32 %v178_v25, 0.0 }
  0xbd   :  { %v182_v28 = vpack.c.bf16 %v181_v27, %v180_v26 }
  0xbf   :  { %259 = vmatmul.bf16.vlgmr.msra.gmra.mxu1 %v182_v28 }
 0x13c   :  { %v260_v33 = vpop.f32.mrf.mxu1 }
 0x13d   :  { %v261_v35 = vadd.f32 %v508_v34, %v260_v33 }
 0x13f   :  { %v265_v38 = vmax.f32 %v261_v35, 0.0 }
 0x144   :  { %v262_v36 = vpop.f32.mrf.mxu1 }
 0x145   :  { %v263_v37 = vadd.f32 %v508_v34, %v262_v36 }
 0x147   :  { %v266_v39 = vmax.f32 %v263_v37, 0.0 }
 0x149   :  { %v267_v40 = vpack.c.bf16 %v266_v39, %v265_v38 }
 0x14b   :  { %344 = vmatmul.bf16.vlgmr.msra.gmra.mxu2 %v267_v40 }
 0x1ce   :  { %v345_v42 = vpop.f32.mrf.mxu2 }
 0x1cf   :  { %v346_v43 = vadd.f32 %v509_v41, %v345_v42 }
 0x1d1   :  { %350 = vst [vmem:[#allocation10] sm:$0xff] %v346_v43 }
 0x1d6   :  { %v347_v44 = vpop.f32.mrf.mxu2 }
 0x1d7   :  { %v348_v45 = vadd.f32 %v509_v41, %v347_v44 }
 0x1d9   :  { %351 = vst [vmem:[#allocation10 + $0x8] sm:$0xff] %v348_v45 }
 0x1da   :  { %364 = dma.vmem_to_hbm [thread:$0]  %s357_s25, 256, %s359_s4, [#allocation4], %s645_s28, %s645_s28, %s646_s29  }
 0x1db   :  { %636 = dma.done.wait [#allocation4], 256  }
 0x1dc   :  { %637 = vsyncadd [#allocation4], 4294967040 }
 0x1dd   :  { %369 = vsyncpa [#allocation3], 1 }
 0x1de   :  { %370 = vsyncpa [#allocation6], 1 }
 0x1df   :  { %371 = vsyncpa [#allocation9], 1 }
 0x1e0   :  { %372 = vsyncpa [#allocation4], 1 }

// kernel: tpu_custom_call.1
= control target key start
LH: loop header
LB: loop body
LE: loop exit
PB: predicated region body
PF: predicated region fallthrough
CT: control target
= control target key end

     0   :  { %12 = vsyncpa [#allocation3], 0  ;;  %s711_s0 = inlined_call_operand.hbm [shape: bf16[16,128], index: 0, kind: input, shape index: {}]   ;;  %s712_s1 = inlined_call_operand.hbm [shape: bf16[128,128], index: 1, kind: input, shape index: {}]   ;;  %s713_s2 = inlined_call_operand.vmem [shape: f32[1,128], index: 2, kind: input, shape index: {}]   ;;  %s714_s3 = inlined_call_operand.hbm [shape: bf16[128,128], index: 3, kind: input, shape index: {}]   ;;  %s715_s4 = inlined_call_operand.vmem [shape: f32[1,128], index: 4, kind: input, shape index: {}]   ;;  %s716_s5 = inlined_call_operand.hbm [shape: bf16[128,128], index: 5, kind: input, shape index: {}]   ;;  %s717_s6 = inlined_call_operand.vmem [shape: f32[1,128], index: 6, kind: input, shape index: {}]   ;;  %s718_s7 = inlined_call_operand.hbm [shape: f32[16,128], index: 7, kind: output, shape index: {}]  }
   0x1   :  { %13 = vsyncpa [#allocation6], 0 }
   0x2   :  { %14 = vsyncpa [#allocation9], 0 }
   0x3   :  { %15 = vsyncpa [#allocation4], 0  ;;  %s33_s26 = sshll.u32 %s712_s1, 4  ;;  %s638_s27 = smov [#allocation5]   ;;  %s34_s26 = int_to_ptr.hbm [resolvable:$true] %s33_s26 }
   0x4   :  { %s35_s28 = sshll.u32 %s638_s27, 4  ;;  %s20_s8 = sshll.u32 %s711_s0, 4  ;;  %s36_s28 = int_to_ptr.vmem [resolvable:$true] %s35_s28  ;;  %s21_s8 = int_to_ptr.hbm [resolvable:$true] %s20_s8 }
   0x5   :  { %s639_s9 = smov 64   ;;  %s640_s10 = smov 4  }
   0x6   :  { %41 = dma.hbm_to_vmem [thread:$0]  %s34_s26, 1024, %s36_s28, [#allocation6], %s639_s9, %s639_s9, %s640_s10  }
   0x7   :  { %s641_s11 = smov [#allocation2]   ;;  %s48_s15 = sshll.u32 %s714_s3, 4  ;;  %s49_s15 = int_to_ptr.hbm [resolvable:$true] %s48_s15 }
   0x8   :  { %s22_s12 = sshll.u32 %s641_s11, 4  ;;  %s63_s17 = sshll.u32 %s716_s5, 4  ;;  %s23_s12 = int_to_ptr.vmem [resolvable:$true] %s22_s12  ;;  %s64_s17 = int_to_ptr.hbm [resolvable:$true] %s63_s17 }
   0x9   :  { %28 = dma.hbm_to_vmem [thread:$0]  %s21_s8, 128, %s23_s12, [#allocation3], %s639_s9, %s639_s9, %s640_s10  }
   0xa   :  { %s642_s18 = smov [#allocation7]   ;;  %s643_s0 = smov [#allocation8]  }
   0xb   :  { %s50_s19 = sshll.u32 %s642_s18, 4  ;;  %s65_s20 = sshll.u32 %s643_s0, 4  ;;  %s51_s19 = int_to_ptr.vmem [resolvable:$true] %s50_s19  ;;  %s66_s20 = int_to_ptr.vmem [resolvable:$true] %s65_s20 }
   0xc   :  { %56 = dma.hbm_to_vmem [thread:$0]  %s49_s15, 1024, %s51_s19, [#allocation6], %s639_s9, %s639_s9, %s640_s10  }
   0xd   :  { %71 = dma.hbm_to_vmem [thread:$0]  %s64_s17, 1024, %s66_s20, [#allocation9], %s639_s9, %s639_s9, %s640_s10  }
   0xe   :  { %630 = dma.done.wait [#allocation3], 128  }
   0xf   :  { %631 = vsyncadd [#allocation3], 4294967168 }
  0x10   :  { %632 = dma.done.wait [#allocation6], 2048  }
  0x11   :  { %633 = vsyncadd [#allocation6], 4294965248 }
  0x12   :  { %634 = dma.done.wait [#allocation9], 1024  }
  0x13   :  { %635 = vsyncadd [#allocation9], 4294966272  ;;  %v481_v0 = vld [vmem:[#allocation5 + $0x38] sm:$0xff]  ;;  %v480_v1 = vld [vmem:[#allocation5 + $0x30] sm:$0xff]  ;;  %s644_s24 = smov [#allocation10]   ;;  %s645_s28 = smov 128  }
  0x14   :  { %166 = vmatpush.bf16.msra.mxu0 %v481_v0  ;;  %v489_v2 = vld [vmem:[#allocation7 + $0x38] sm:$0xff]  ;;  %v488_v3 = vld [vmem:[#allocation7 + $0x30] sm:$0xff]  ;;  %v479_v4 = vld [vmem:[#allocation5 + $0x28] sm:$0xff]  ;;  %s356_s25 = sshll.u32 %s644_s24, 4  ;;  %s646_s29 = smov 8   ;;  %s357_s25 = int_to_ptr.vmem [resolvable:$true] %s356_s25 }
  0x15   :  { %251 = vmatpush.bf16.msra.mxu1 %v489_v2  ;;  %v487_v5 = vld [vmem:[#allocation7 + $0x28] sm:$0xff]  ;;  %v478_v6 = vld [vmem:[#allocation5 + $0x20] sm:$0xff]  ;;  %v477_v8 = vld [vmem:[#allocation5 + $0x18] sm:$0xff] }
  0x16   :  { %v486_v7 = vld [vmem:[#allocation7 + $0x20] sm:$0xff]  ;;  %v476_v9 = vld [vmem:[#allocation5 + $0x10] sm:$0xff]  ;;  %v475_v10 = vld [vmem:[#allocation5 + $0x8] sm:$0xff] }
  0x17   :  { %v474_v11 = vld [vmem:[#allocation5] sm:$0xff]  ;;  %v473_v12 = vld [vmem:[#allocation2] sm:$0xff]  ;;  %v484_v14 = vld [vmem:[#allocation7 + $0x10] sm:$0xff] }
  0x18   :  { %167 = vmatpush.bf16.msra.mxu0 %v480_v1  ;;  %v485_v13 = vld [vmem:[#allocation7 + $0x18] sm:$0xff]  ;;  %v483_v15 = vld [vmem:[#allocation7 + $0x8] sm:$0xff]  ;;  %v482_v16 = vld [vmem:[#allocation7] sm:$0xff] }
  0x19   :  { %252 = vmatpush.bf16.msra.mxu1 %v488_v3  ;;  %v497_v17 = vld [vmem:[#allocation8 + $0x38] sm:$0xff]  ;;  %v496_v18 = vld [vmem:[#allocation8 + $0x30] sm:$0xff]  ;;  %v495_v19 = vld [vmem:[#allocation8 + $0x28] sm:$0xff] }
  0x1a   :  { %336 = vmatpush.bf16.msra.mxu2 %v497_v17  ;;  %v494_v20 = vld [vmem:[#allocation8 + $0x20] sm:$0xff]  ;;  %v507_v22 = vld [vmem:[%s713_s2] ss:$0 sm:$0xff]  ;;  %v492_v30 = vld [vmem:[#allocation8 + $0x10] sm:$0xff] }
  0x1b   :  { %v493_v29 = vld [vmem:[#allocation8 + $0x18] sm:$0xff]  ;;  %v491_v31 = vld [vmem:[#allocation8 + $0x8] sm:$0xff]  ;;  %v490_v32 = vld [vmem:[#allocation8] sm:$0xff] }
  0x1c   :  { %168 = vmatpush.bf16.msra.mxu0 %v479_v4  ;;  %v508_v34 = vld [vmem:[%s715_s4] ss:$0 sm:$0xff]  ;;  %s358_s4 = sshll.u32 %s718_s7, 4  ;;  %s359_s4 = int_to_ptr.hbm [resolvable:$true] %s358_s4 }
  0x1d   :  { %253 = vmatpush.bf16.msra.mxu1 %v487_v5  ;;  %v509_v41 = vld [vmem:[%s717_s6] ss:$0 sm:$0xff] }
  0x1e   :  { %337 = vmatpush.bf16.msra.mxu2 %v496_v18 }
  0x20   :  { %169 = vmatpush.bf16.msra.mxu0 %v478_v6 }
  0x21   :  { %254 = vmatpush.bf16.msra.mxu1 %v486_v7 }
  0x22   :  { %338 = vmatpush.bf16.msra.mxu2 %v495_v19 }
  0x24   :  { %170 = vmatpush.bf16.msra.mxu0 %v477_v8 }
  0x25   :  { %255 = vmatpush.bf16.msra.mxu1 %v485_v13 }
  0x26   :  { %339 = vmatpush.bf16.msra.mxu2 %v494_v20 }
  0x28   :  { %171 = vmatpush.bf16.msra.mxu0 %v476_v9 }
  0x29   :  { %256 = vmatpush.bf16.msra.mxu1 %v484_v14 }
  0x2a   :  { %340 = vmatpush.bf16.msra.mxu2 %v493_v29 }
  0x2c   :  { %172 = vmatpush.bf16.msra.mxu0 %v475_v10 }
  0x2d   :  { %257 = vmatpush.bf16.msra.mxu1 %v483_v15 }
  0x2e   :  { %341 = vmatpush.bf16.msra.mxu2 %v492_v30 }
  0x30   :  { %173 = vmatpush.bf16.msra.mxu0 %v474_v11 }
  0x31   :  { %258 = vmatpush.bf16.msra.mxu1 %v482_v16 }
  0x32   :  { %342 = vmatpush.bf16.msra.mxu2 %v491_v31 }
  0x33   :  { %174 = vmatmul.bf16.vlgmr.msra.gmra.mxu0 %v473_v12 }
  0x36   :  { %343 = vmatpush.bf16.msra.mxu2 %v490_v32 }
  0xb0   :  { %v175_v21 = vpop.f32.mrf.mxu0 }
  0xb1   :  { %v176_v23 = vadd.f32 %v507_v22, %v175_v21 }
  0xb3   :  { %v180_v26 = vmax.f32 %v176_v23, 0.0 }
  0xb8   :  { %v177_v24 = vpop.f32.mrf.mxu0 }
  0xb9   :  { %v178_v25 = vadd.f32 %v507_v22, %v177_v24 }
  0xbb   :  { %v181_v27 = vmax.f32 %v178_v25, 0.0 }
  0xbd   :  { %v182_v28 = vpack.c.bf16 %v181_v27, %v180_v26 }
  0xbf   :  { %259 = vmatmul.bf16.vlgmr.msra.gmra.mxu1 %v182_v28 }
 0x13c   :  { %v260_v33 = vpop.f32.mrf.mxu1 }
 0x13d   :  { %v261_v35 = vadd.f32 %v508_v34, %v260_v33 }
 0x13f   :  { %v265_v38 = vmax.f32 %v261_v35, 0.0 }
 0x144   :  { %v262_v36 = vpop.f32.mrf.mxu1 }
 0x145   :  { %v263_v37 = vadd.f32 %v508_v34, %v262_v36 }
 0x147   :  { %v266_v39 = vmax.f32 %v263_v37, 0.0 }
 0x149   :  { %v267_v40 = vpack.c.bf16 %v266_v39, %v265_v38 }
 0x14b   :  { %344 = vmatmul.bf16.vlgmr.msra.gmra.mxu2 %v267_v40 }
 0x1ce   :  { %v345_v42 = vpop.f32.mrf.mxu2 }
 0x1cf   :  { %v346_v43 = vadd.f32 %v509_v41, %v345_v42 }
 0x1d1   :  { %350 = vst [vmem:[#allocation10] sm:$0xff] %v346_v43 }
 0x1d6   :  { %v347_v44 = vpop.f32.mrf.mxu2 }
 0x1d7   :  { %v348_v45 = vadd.f32 %v509_v41, %v347_v44 }
 0x1d9   :  { %351 = vst [vmem:[#allocation10 + $0x8] sm:$0xff] %v348_v45 }
 0x1da   :  { %364 = dma.vmem_to_hbm [thread:$0]  %s357_s25, 256, %s359_s4, [#allocation4], %s645_s28, %s645_s28, %s646_s29  }
 0x1db   :  { %636 = dma.done.wait [#allocation4], 256  }
 0x1dc   :  { %637 = vsyncadd [#allocation4], 4294967040 }
 0x1dd   :  { %369 = vsyncpa [#allocation3], 1 }
 0x1de   :  { %370 = vsyncpa [#allocation6], 1 }
 0x1df   :  { %371 = vsyncpa [#allocation9], 1 }
 0x1e0   :  { %372 = vsyncpa [#allocation4], 1 }

</bundles_post_ra>
